<compile_context>
chip_gen: v6e
topology: v6e:2x2x1
jax: 0.10.0
libtpu: 0.0.40
codegen_flags: <defaults>
</compile_context>

<pallas_src>
import functools

import jax
import jax.numpy as jnp
from jax import lax
from jax.experimental import pallas as pl
from jax.experimental.pallas import tpu as pltpu

_LANE = 128
_SUB = 8


# ---------------------------------------------------------------------------
# Kernel
# ---------------------------------------------------------------------------
def _channel_attention_kernel(x_ref, w1t_ref, w2t_ref, o_ref,
                              sum_acc, max_acc, *, hw, thw, needs_mask):
    # x_ref   : (TB, C, THW)   current (batch-tile, HW-tile) block
    # w1t_ref : (C, Cr)        first 1x1 conv weight, pre-transposed
    # w2t_ref : (Cr, C)        second 1x1 conv weight, pre-transposed
    # o_ref   : (TB, C)        lane-dense attention weights for this batch tile
    # sum_acc / max_acc : (TB, C) f32 scratch, persistent across the HW axis
    h = pl.program_id(1)
    n_hw = pl.num_programs(1)

    @pl.when(h == 0)
    def _init():
        sum_acc[...] = jnp.zeros(sum_acc.shape, sum_acc.dtype)
        max_acc[...] = jnp.full(max_acc.shape, -jnp.inf, max_acc.dtype)

    tb, c = sum_acc.shape
    n_chunks = thw // _LANE  # static

    # Single pass over the tile: each 128-lane chunk is read once and feeds
    # both the running sum and the running max (pure VPU work).
    def _pool_body(i, carry):
        s, m = carry
        start = pl.multiple_of(i * _LANE, _LANE)
        chunk = x_ref[:, :, pl.ds(start, _LANE)].astype(jnp.float32)
        if needs_mask:  # static flag: only emitted when spatial padding exists
            col = (h * thw + i * _LANE
                   + lax.broadcasted_iota(jnp.int32, chunk.shape, 2))
            valid = col < hw
            s = s + jnp.where(valid, chunk, 0.0)
            m = jnp.maximum(m, jnp.where(valid, chunk, -jnp.inf))
        else:
            s = s + chunk
            m = jnp.maximum(m, chunk)
        return s, m

    s0 = jnp.zeros((tb, c, _LANE), jnp.float32)
    m0 = jnp.full((tb, c, _LANE), -jnp.inf, jnp.float32)
    s, m = lax.fori_loop(0, n_chunks, _pool_body, (s0, m0),
                         unroll=True if n_chunks <= 8 else 8)

    # One cross-lane reduce per pool per tile.
    sum_acc[...] = sum_acc[...] + jnp.sum(s, axis=-1)
    max_acc[...] = jnp.maximum(max_acc[...], jnp.max(m, axis=-1))

    @pl.when(h == n_hw - 1)
    def _finalize():
        avg_p = sum_acc[...] * (1.0 / hw)          # (TB, C)
        max_p = max_acc[...]                       # (TB, C)
        w1t = w1t_ref[...].astype(jnp.float32)     # (C, Cr)
        w2t = w2t_ref[...].astype(jnp.float32)     # (Cr, C)

        def _mlp(p):
            hid = jnp.maximum(
                jnp.dot(p, w1t, preferred_element_type=jnp.float32), 0.0)
            return jnp.dot(hid, w2t, preferred_element_type=jnp.float32)

        logits = _mlp(avg_p) + _mlp(max_p)
        o_ref[...] = jax.nn.sigmoid(logits).astype(o_ref.dtype)


# ---------------------------------------------------------------------------
# Tiling / VMEM helpers
# ---------------------------------------------------------------------------
def _round_up(x, m):
    return -(-x // m) * m


def _vmem_scoped_limit_bytes():
    """Generation-aware scoped-VMEM limit (passed as vmem_limit_bytes)."""
    try:
        phys = int(pltpu.get_tpu_info().vmem_capacity_bytes)
    except Exception:
        phys = 64 << 20  # conservative: v7x per-core physical VMEM
    # Half of physical, clamped: 32 MiB on v7x, 64 MiB on v5e/v6e.
    return max(16 << 20, min(phys // 2, 64 << 20))


def _choose_tiling(B, C, HW, itemsize, scoped_vmem):
    """Pick (TB, THW, Bp, HWt). Tiles sized against ~70% of the scoped limit,
    counting double-buffered input blocks; the remainder covers weights,
    output, accumulators and the f32 working vregs."""
    block_budget = int(scoped_vmem * 0.70) // 2  # per input buffer

    # Batch tile: >= 2 "parallel" grid steps (v7x has 2 TensorCores) whenever
    # the tile can stay a multiple of 8; tiny batches take one full block.
    if B >= 2 * _SUB:
        TB = max(_SUB, ((B // 4) // _SUB) * _SUB)
    else:
        TB = B

    HWp = _round_up(HW, _LANE)

    def full_block_bytes(tb):
        return tb * C * HWp * itemsize

    # Shrink the batch tile (multiples of 8) before resorting to HW tiling.
    while TB > _SUB and TB % _SUB == 0 and full_block_bytes(TB) > block_budget:
        TB -= _SUB

    if full_block_bytes(TB) <= block_budget:
        THW = HWp
    else:
        # Mandatory HW tiling (e.g. big C*HW on v7x's 64 MiB VMEM).
        THW = max(_LANE,
                  (block_budget // max(1, TB * C * itemsize)) // _LANE * _LANE)

    HWt = _round_up(HW, THW)
    Bp = _round_up(B, TB)
    return TB, THW, Bp, HWt


# ---------------------------------------------------------------------------
# Wrapper
# ---------------------------------------------------------------------------
def channel_attention(x, w1, w2, *, hw_tile=None):
    """ChannelAttention forward.  x: (B, C, H, W).  Returns (B, C, 1, 1).

    w1: weight of nn.Conv2d(C, C//ratio, 1, bias=False) — (Cr, C) or (Cr, C, 1, 1)
    w2: weight of nn.Conv2d(C//ratio, C, 1, bias=False) — (C, Cr) or (C, Cr, 1, 1)
    hw_tile: optional override for the HW tile size (testing / tuning).
    """
    B, C, H, W = x.shape
    w1 = jnp.asarray(w1)
    w2 = jnp.asarray(w2)
    if w1.ndim == 4:
        w1 = w1.reshape(w1.shape[0], w1.shape[1])
    if w2.ndim == 4:
        w2 = w2.reshape(w2.shape[0], w2.shape[1])
    Cr = w1.shape[0]
    assert w1.shape == (Cr, C) and w2.shape == (C, Cr)

    HW = H * W
    x_flat = x.reshape(B, C, HW)
    itemsize = x_flat.dtype.itemsize

    scoped_vmem = _vmem_scoped_limit_bytes()
    TB, THW, Bp, HWt = _choose_tiling(B, C, HW, itemsize, scoped_vmem)
    if hw_tile is not None:
        THW = max(_LANE, (int(hw_tile) // _LANE) * _LANE)
        THW = min(THW, _round_up(HW, _LANE))
        HWt = _round_up(HW, THW)

    needs_mask = (HWt != HW)
    if Bp != B or HWt != HW:
        x_flat = jnp.pad(x_flat, ((0, Bp - B), (0, 0), (0, HWt - HW)))

    # Pre-transpose weights so the kernel issues plain (M,K)x(K,N) matmuls.
    w1t = w1.T  # (C, Cr)
    w2t = w2.T  # (Cr, C)

    n_b = Bp // TB
    n_hw = HWt // THW

    kernel = functools.partial(_channel_attention_kernel,
                               hw=HW, thw=THW, needs_mask=needs_mask)

    out = pl.pallas_call(
        kernel,
        out_shape=jax.ShapeDtypeStruct((Bp, C), x.dtype),
        grid_spec=pltpu.PrefetchScalarGridSpec(
            num_scalar_prefetch=0,
            grid=(n_b, n_hw),
            in_specs=[
                pl.BlockSpec((TB, C, THW), lambda b, h: (b, 0, h)),
                pl.BlockSpec((C, Cr), lambda b, h: (0, 0)),
                pl.BlockSpec((Cr, C), lambda b, h: (0, 0)),
            ],
            out_specs=pl.BlockSpec((TB, C), lambda b, h: (b, 0)),
            scratch_shapes=[
                pltpu.VMEM((TB, C), jnp.float32),   # running sum
                pltpu.VMEM((TB, C), jnp.float32),   # running max
            ],
        ),
        compiler_params=pltpu.CompilerParams(
            dimension_semantics=("parallel", "arbitrary"),
            vmem_limit_bytes=scoped_vmem,
        ),
    )(x_flat, w1t, w2t)

    return out[:B].reshape(B, C, 1, 1)


# ---------------------------------------------------------------------------
# Pure-JAX reference (mirrors the PyTorch forward)
# ---------------------------------------------------------------------------
def _reference(x, w1, w2):
    avg_p = jnp.mean(x, axis=(2, 3))  # (B, C)
    max_p = jnp.max(x, axis=(2, 3))   # (B, C)

    def fc(p):
        h = jnp.maximum(p @ w1.T, 0.0)
        return h @ w2.T

    out = jax.nn.sigmoid(fc(avg_p) + fc(max_p))
    return out[:, :, None, None]


if __name__ == "__main__":
    # Module config: in_planes=16, ratio=8 -> hidden = 2
    B, C, H, W = 2, 16, 16, 16
    ratio = 8
    Cr = C // ratio

    key = jax.random.PRNGKey(0)
    kx, k1, k2 = jax.random.split(key, 3)

    x = jax.random.normal(kx, (B, C, H, W), dtype=jnp.float32)
    # Raw PyTorch Conv2d weight layouts: (out, in, 1, 1)
    w1 = jax.random.normal(k1, (Cr, C, 1, 1), dtype=jnp.float32) * 0.2
    w2 = jax.random.normal(k2, (C, Cr, 1, 1), dtype=jnp.float32) * 0.2

    out = jax.block_until_ready(channel_attention(x, w1, w2))
    ref = _reference(x, w1.reshape(Cr, C), w2.reshape(C, Cr))
    assert out.shape == (B, C, 1, 1)
    assert jnp.allclose(out, ref, atol=1e-5, rtol=1e-5), "mismatch vs reference"

    # Extra coverage: ragged spatial size (lane-mask path) and a forced small
    # HW tile (multi-step accumulator path across the 'arbitrary' axis).
    for (Bx, Hx, Wx, hw_tile) in [(3, 10, 10, None), (3, 20, 20, 128)]:
        kx2 = jax.random.fold_in(kx, Bx * 1000 + Hx * Wx)
        x2 = jax.random.normal(kx2, (Bx, C, Hx, Wx), dtype=jnp.float32)
        out2 = jax.block_until_ready(channel_attention(x2, w1, w2, hw_tile=hw_tile))
        ref2 = _reference(x2, w1.reshape(Cr, C), w2.reshape(C, Cr))
        assert out2.shape == (Bx, C, 1, 1)
        assert jnp.allclose(out2, ref2, atol=1e-5, rtol=1e-5), "masked/tiled mismatch"

    print("KERNEL_OK")
</pallas_src>

<mosaic_0001>
module attributes {stable_mosaic.version = 11 : i64} {
  func.func @_channel_attention_kernel(%arg0: i32, %arg1: i32, %arg2: memref<2x16x256xf32, #tpu.memory_space<vmem>>, %arg3: memref<16x2xf32, #tpu.memory_space<vmem>>, %arg4: memref<2x16xf32, #tpu.memory_space<vmem>>, %arg5: memref<2x16xf32, #tpu.memory_space<vmem>>, %arg6: memref<2x16xf32, #tpu.memory_space<vmem>>, %arg7: memref<2x16xf32, #tpu.memory_space<vmem>>) attributes {dimension_semantics = [#tpu.dimension_semantics<parallel>, #tpu.dimension_semantics<arbitrary>], iteration_bounds = array<i64: 1, 1>, scalar_prefetch = 0 : i64, scratch_operands = 2 : i64, tpu.core_type = #tpu.core_type<tc>, window_params = [{transform_indices = @transform_0, window_bounds = array<i64: 2, 16, 256>}, {pipeline_mode = #tpu.pipeline_mode<synchronous>, transform_indices = @transform_1, window_bounds = array<i64: 16, 2>}, {pipeline_mode = #tpu.pipeline_mode<synchronous>, transform_indices = @transform_2, window_bounds = array<i64: 2, 16>}, {transform_indices = @transform_3, window_bounds = array<i64: 2, 16>}]} {
    %c0_i32 = arith.constant 0 : i32
    %0 = arith.cmpi eq, %arg1, %c0_i32 : i32
    %1 = arith.extui %0 : i1 to i32
    %c0_i32_0 = arith.constant 0 : i32
    %2 = arith.cmpi ne, %1, %c0_i32_0 : i32
    scf.if %2 {
      %cst_19 = arith.constant 0.000000e+00 : f32
      %28 = vector.broadcast %cst_19 : f32 to vector<2x16xf32>
      %c0_20 = arith.constant 0 : index
      %c0_21 = arith.constant 0 : index
      %29 = vector.load %arg6[%c0_20, %c0_21] : memref<2x16xf32, #tpu.memory_space<vmem>>, vector<2x16xf32>
      tpu.vector_store %arg6[%c0_20, %c0_21], %28 {strides = array<i32>} : memref<2x16xf32, #tpu.memory_space<vmem>>, vector<2x16xf32>,
      %cst_22 = arith.constant 0xFF800000 : f32
      %30 = vector.broadcast %cst_22 : f32 to vector<2x16xf32>
      %c0_23 = arith.constant 0 : index
      %c0_24 = arith.constant 0 : index
      %31 = vector.load %arg7[%c0_23, %c0_24] : memref<2x16xf32, #tpu.memory_space<vmem>>, vector<2x16xf32>
      tpu.vector_store %arg7[%c0_23, %c0_24], %30 {strides = array<i32>} : memref<2x16xf32, #tpu.memory_space<vmem>>, vector<2x16xf32>,
    } else {
    }
    %cst = arith.constant 0.000000e+00 : f32
    %3 = vector.broadcast %cst : f32 to vector<2x16x128xf32>
    %cst_1 = arith.constant 0xFF800000 : f32
    %4 = vector.broadcast %cst_1 : f32 to vector<2x16x128xf32>
    %c0_i32_2 = arith.constant 0 : i32
    %c128_i32 = arith.constant 128 : i32
    %5 = arith.muli %c0_i32_2, %c128_i32 : i32
    %6 = tpu.assume_multiple %5, 128 : i32
    %c0 = arith.constant 0 : index
    %c0_3 = arith.constant 0 : index
    %7 = arith.index_cast %6 : i32 to index
    %8 = vector.load %arg2[%c0, %c0_3, %7] : memref<2x16x256xf32, #tpu.memory_space<vmem>>, vector<2x16x128xf32>
    %9 = arith.addf %3, %8 : vector<2x16x128xf32>
    %10 = arith.maximumf %4, %8 : vector<2x16x128xf32>
    %c1_i32 = arith.constant 1 : i32
    %c128_i32_4 = arith.constant 128 : i32
    %11 = arith.muli %c1_i32, %c128_i32_4 : i32
    %12 = tpu.assume_multiple %11, 128 : i32
    %c0_5 = arith.constant 0 : index
    %c0_6 = arith.constant 0 : index
    %13 = arith.index_cast %12 : i32 to index
    %14 = vector.load %arg2[%c0_5, %c0_6, %13] : memref<2x16x256xf32, #tpu.memory_space<vmem>>, vector<2x16x128xf32>
    %15 = arith.addf %9, %14 : vector<2x16x128xf32>
    %16 = arith.maximumf %10, %14 : vector<2x16x128xf32>
    %c2_i32 = arith.constant 2 : i32
    %c0_7 = arith.constant 0 : index
    %c0_8 = arith.constant 0 : index
    %17 = vector.load %arg6[%c0_7, %c0_8] : memref<2x16xf32, #tpu.memory_space<vmem>>, vector<2x16xf32>
    %cst_9 = arith.constant dense<0.000000e+00> : vector<2x16xf32>
    %18 = vector.multi_reduction <add>, %15, %cst_9 [2] : vector<2x16x128xf32> to vector<2x16xf32>
    %19 = arith.addf %17, %18 : vector<2x16xf32>
    %c0_10 = arith.constant 0 : index
    %c0_11 = arith.constant 0 : index
    %20 = vector.load %arg6[%c0_10, %c0_11] : memref<2x16xf32, #tpu.memory_space<vmem>>, vector<2x16xf32>
    tpu.vector_store %arg6[%c0_10, %c0_11], %19 {strides = array<i32>} : memref<2x16xf32, #tpu.memory_space<vmem>>, vector<2x16xf32>,
    %c0_12 = arith.constant 0 : index
    %c0_13 = arith.constant 0 : index
    %21 = vector.load %arg7[%c0_12, %c0_13] : memref<2x16xf32, #tpu.memory_space<vmem>>, vector<2x16xf32>
    %cst_14 = arith.constant dense<0xFF800000> : vector<2x16xf32>
    %22 = vector.multi_reduction <maximumf>, %16, %cst_14 [2] : vector<2x16x128xf32> to vector<2x16xf32>
    %23 = arith.maximumf %21, %22 : vector<2x16xf32>
    %c0_15 = arith.constant 0 : index
    %c0_16 = arith.constant 0 : index
    %24 = vector.load %arg7[%c0_15, %c0_16] : memref<2x16xf32, #tpu.memory_space<vmem>>, vector<2x16xf32>
    tpu.vector_store %arg7[%c0_15, %c0_16], %23 {strides = array<i32>} : memref<2x16xf32, #tpu.memory_space<vmem>>, vector<2x16xf32>,
    %c0_i32_17 = arith.constant 0 : i32
    %25 = arith.cmpi eq, %arg1, %c0_i32_17 : i32
    %26 = arith.extui %25 : i1 to i32
    %c0_i32_18 = arith.constant 0 : i32
    %27 = arith.cmpi ne, %26, %c0_i32_18 : i32
    scf.if %27 {
      %c0_19 = arith.constant 0 : index
      %c0_20 = arith.constant 0 : index
      %28 = vector.load %arg6[%c0_19, %c0_20] : memref<2x16xf32, #tpu.memory_space<vmem>>, vector<2x16xf32>
      %cst_21 = arith.constant 3.906250e-03 : f32
      %29 = vector.broadcast %cst_21 : f32 to vector<2x16xf32>
      %30 = arith.mulf %28, %29 : vector<2x16xf32>
      %c0_22 = arith.constant 0 : index
      %c0_23 = arith.constant 0 : index
      %31 = vector.load %arg7[%c0_22, %c0_23] : memref<2x16xf32, #tpu.memory_space<vmem>>, vector<2x16xf32>
      %c0_24 = arith.constant 0 : index
      %c0_25 = arith.constant 0 : index
      %32 = vector.load %arg3[%c0_24, %c0_25] : memref<16x2xf32, #tpu.memory_space<vmem>>, vector<16x2xf32>
      %c0_26 = arith.constant 0 : index
      %c0_27 = arith.constant 0 : index
      %33 = vector.load %arg4[%c0_26, %c0_27] : memref<2x16xf32, #tpu.memory_space<vmem>>, vector<2x16xf32>
      %cst_28 = arith.constant dense<0.000000e+00> : vector<2x2xf32>
      %34 = tpu.matmul %30, %32, %cst_28 {dimension_numbers = #tpu.dot_dimension_numbers<[1], [0], [0], [1], [0, 0, 1, 1], [], []>} : vector<2x16xf32>, vector<16x2xf32>, vector<2x2xf32> -> vector<2x2xf32>
      %cst_29 = arith.constant 0.000000e+00 : f32
      %35 = vector.broadcast %cst_29 : f32 to vector<2x2xf32>
      %36 = arith.maximumf %34, %35 : vector<2x2xf32>
      %cst_30 = arith.constant dense<0.000000e+00> : vector<2x16xf32>
      %37 = tpu.matmul %36, %33, %cst_30 {dimension_numbers = #tpu.dot_dimension_numbers<[1], [0], [0], [1], [0, 0, 1, 1], [], []>} : vector<2x2xf32>, vector<2x16xf32>, vector<2x16xf32> -> vector<2x16xf32>
      %cst_31 = arith.constant dense<0.000000e+00> : vector<2x2xf32>
      %38 = tpu.matmul %31, %32, %cst_31 {dimension_numbers = #tpu.dot_dimension_numbers<[1], [0], [0], [1], [0, 0, 1, 1], [], []>} : vector<2x16xf32>, vector<16x2xf32>, vector<2x2xf32> -> vector<2x2xf32>
      %cst_32 = arith.constant 0.000000e+00 : f32
      %39 = vector.broadcast %cst_32 : f32 to vector<2x2xf32>
      %40 = arith.maximumf %38, %39 : vector<2x2xf32>
      %cst_33 = arith.constant dense<0.000000e+00> : vector<2x16xf32>
      %41 = tpu.matmul %40, %33, %cst_33 {dimension_numbers = #tpu.dot_dimension_numbers<[1], [0], [0], [1], [0, 0, 1, 1], [], []>} : vector<2x2xf32>, vector<2x16xf32>, vector<2x16xf32> -> vector<2x16xf32>
      %42 = arith.addf %37, %41 : vector<2x16xf32>
      %43 = arith.negf %42 : vector<2x16xf32>
      %44 = math.exp %43 : vector<2x16xf32>
      %cst_34 = arith.constant 1.000000e+00 : f32
      %45 = vector.broadcast %cst_34 : f32 to vector<2x16xf32>
      %46 = arith.addf %45, %44 : vector<2x16xf32>
      %47 = arith.divf %45, %46 : vector<2x16xf32>
      %c0_35 = arith.constant 0 : index
      %c0_36 = arith.constant 0 : index
      %48 = vector.load %arg5[%c0_35, %c0_36] : memref<2x16xf32, #tpu.memory_space<vmem>>, vector<2x16xf32>
      tpu.vector_store %arg5[%c0_35, %c0_36], %47 {strides = array<i32>} : memref<2x16xf32, #tpu.memory_space<vmem>>, vector<2x16xf32>,
    } else {
    }
    return
  }
  func.func @transform_0(%arg0: i32, %arg1: i32) -> (i32, i32, i32) {
    %c0_i32 = arith.constant 0 : i32
    %c0_i32_0 = arith.constant 0 : i32
    return %arg0, %c0_i32, %arg1 : i32, i32, i32
  }
  func.func @transform_1(%arg0: i32, %arg1: i32) -> (i32, i32) {
    %c0_i32 = arith.constant 0 : i32
    %c0_i32_0 = arith.constant 0 : i32
    %c0_i32_1 = arith.constant 0 : i32
    return %c0_i32, %c0_i32_0 : i32, i32
  }
  func.func @transform_2(%arg0: i32, %arg1: i32) -> (i32, i32) {
    %c0_i32 = arith.constant 0 : i32
    %c0_i32_0 = arith.constant 0 : i32
    %c0_i32_1 = arith.constant 0 : i32
    return %c0_i32, %c0_i32_0 : i32, i32
  }
  func.func @transform_3(%arg0: i32, %arg1: i32) -> (i32, i32) {
    %c0_i32 = arith.constant 0 : i32
    %c0_i32_0 = arith.constant 0 : i32
    return %arg0, %c0_i32 : i32, i32
  }
}

</mosaic_0001>

<bundles_post_ra>
// kernel: tpu_custom_call.1
= control target key start
LH: loop header
LB: loop body
LE: loop exit
PB: predicated region body
PF: predicated region fallthrough
CT: control target
= control target key end

     0   :  { %8 = vsyncpa [#allocation5], 0  ;;  %s628_s0 = inlined_call_operand.hbm [shape: f32[2,16,256], index: 0, kind: input, shape index: {}]   ;;  %s629_s1 = inlined_call_operand.vmem [shape: f32[16,2], index: 1, kind: input, shape index: {}]   ;;  %s630_s2 = inlined_call_operand.vmem [shape: f32[2,16], index: 2, kind: input, shape index: {}]   ;;  %s631_s3 = inlined_call_operand.hbm [shape: f32[2,16], index: 3, kind: output, shape index: {}]  }
   0x1   :  { %9 = vsyncpa [#allocation6], 0  ;;  %s560_s12 = smov [#allocation4]  }
   0x2   :  { %s15_s13 = sshll.u32 %s560_s12, 4  ;;  %s16_s13 = int_to_ptr.vmem [resolvable:$true] %s15_s13 }
   0x3   :  { %s524_s14 = scalar_lea.vmem %s16_s13, 1024  ;;  %p529_p1 = scmp.lt.s32.totalorder %s16_s13, %s16_s13 }
   0x4   :  { %p525_p0 = scmp.ne.s32.totalorder %s16_s13, %s524_s14  ;;  %p530_p2 = scmp.lt.s32.totalorder %s524_s14, %s524_s14 }
   0x6   :  { %p531_p3 = por %p530_p2, %p529_p1 }
   0x8   :  { %p532_p4 = pnand %p531_p3, %p525_p0 }
   0xa   :  { %535 = shalt.err (!%p532_p4)
}
   0xb   :  { %s561_s15 = smov 256   ;;  %s562_s16 = smov 16  }
   0xc   :  { %21 = dma.hbm_to_vmem [thread:$0]  %s628_s0, 1024, %s16_s13, [#allocation5], %s561_s15, %s561_s15, %s562_s16  }
   0xd   :  { %556 = dma.done.wait [#allocation5], 1024  }
   0xe   :  { %557 = vsyncadd [#allocation5], 4294966272  ;;  %v38_v0 = vld [vmem:[#allocation4 + $0x20] sm:$0xff]  ;;  %v47_v1 = vld [vmem:[#allocation4 + $0x28] sm:$0xff]  ;;  %vm33_vm0 = vcmask 123904   ;;  %v563_v16 = vmov 0.0   ;;  %v70_v20 = vlaneseq }
   0xf   :  { %v36_v2 = vld [vmem:[#allocation4] sm:$0xff]  ;;  %v51_v3 = vadd.f32 %v47_v1, %v38_v0  ;;  %v45_v4 = vld [vmem:[#allocation4 + $0x8] sm:$0xff]  ;;  %v39_v5 = vld [vmem:[#allocation4 + $0x30] sm:$0xff]  ;;  %v55_v15 = vmax.f32 %v38_v0, %v47_v1  ;;  %34 = vst.msk [vmem:[#allocation2] sm:$0x3] %vm33_vm0, %v563_v16  ;;  %481 = vmatprep.subr.mxu0 %v563_v16  ;;  %488 = vmatprep.subr.mxu1 %v563_v16  ;;  %v564_v17 = vmov -inf  }
  0x10   :  { %v48_v6 = vld [vmem:[#allocation4 + $0x38] sm:$0xff]  ;;  %v49_v7 = vadd.f32 %v45_v4, %v36_v2  ;;  %v37_v8 = vld [vmem:[#allocation4 + $0x10] sm:$0xff]  ;;  %v53_v13 = vmax.f32 %v36_v2, %v45_v4  ;;  %35 = vst.msk [vmem:[#allocation3] sm:$0x3] %vm33_vm0, %v564_v17  ;;  %v140_v18 = vld [vmem:[%s629_s1 + $0x8] sm:$0xff]  ;;  %vm565_vm1 = vmmov 0  }
  0x11   :  { %v46_v9 = vld [vmem:[#allocation4 + $0x18] sm:$0xff]  ;;  %62 = vadd.xlane.f32.xlu1 %v51_v3  ;;  %v52_v10 = vadd.f32 %v48_v6, %v39_v5  ;;  %v56_v14 = vmax.f32 %v39_v5, %v48_v6  ;;  %482 = vmatpush3.msra.mxu0 %v140_v18  ;;  %v71_v21 = vand.u32 127, %v70_v20  ;;  %v73_v22 = vshrl.u32 %v70_v20, 7 }
  0x12   :  { %58 = vadd.xlane.f32.xlu0 %v49_v7  ;;  %v50_v11 = vadd.f32 %v46_v9, %v37_v8  ;;  %v54_v12 = vmax.f32 %v37_v8, %v46_v9  ;;  %489 = vmatpush3.msra.mxu1 %v140_v18  ;;  %v139_v19 = vld [vmem:[%s629_s1] sm:$0xff]  ;;  %vm81_vm2 = vcmask 130112   ;;  %vm92_vm3 = vcmask 1041409  }
  0x13   :  { %483 = vmatprep.subr.mxu0 %v563_v16  ;;  %490 = vmatprep.subr.mxu1 %v563_v16  ;;  %v76_v23 = vadd.s32 4294967288, %v71_v21  ;;  %v74_v25 = vsub.s32 %v71_v21, %v73_v22  ;;  %vm142_vm4 = vcmask 130048   ;;  %v141_v55 = vld [vmem:[%s630_s2] sm:$0x3]  ;;  %vm295_vm5 = vcmask 1041408   ;;  %s566_s2 = smov [#allocation7]  }
  0x14   :  { %484 = vmatpush3.msra.mxu0 %v139_v19  ;;  %485 = vmatprep.mubr.msk.f32.mxu0 %vm565_vm1, %v563_v16  ;;  %vm291_vm6 = vcmask 15360   ;;  %s455_s23 = sshll.u32 %s566_s2, 4  ;;  %s456_s23 = int_to_ptr.vmem [resolvable:$true] %s455_s23 }
  0x15   :  { %64 = vadd.xlane.f32.xlu1 %v52_v10  ;;  %491 = vmatpush3.msra.mxu1 %v139_v19  ;;  %v79_v27 = vsub.s32 %v76_v23, %v73_v22  ;;  %s536_s24 = scalar_lea.vmem %s456_s23, 32  ;;  %p541_p6 = scmp.lt.s32.totalorder %s456_s23, %s456_s23 }
  0x16   :  { %60 = vadd.xlane.f32.xlu0 %v50_v11  ;;  %492 = vmatprep.mubr.msk.f32.mxu1 %vm565_vm1, %v563_v16  ;;  %v57_v35 = vld [vmem:[#allocation2] sm:$0x3]  ;;  %p537_p5 = scmp.ne.s32.totalorder %s456_s23, %s536_s24  ;;  %p542_p7 = scmp.lt.s32.totalorder %s536_s24, %s536_s24 }
  0x17   :  { %500 = vmatprep.subr.mxu1 %v563_v16  ;;  %495 = vmatprep.subr.mxu0 %v563_v16  ;;  %v98_v47 = vld [vmem:[#allocation3] sm:$0x3] }
  0x18   :  { %p543_p8 = por %p542_p7, %p541_p6 }
  0x19   :  { %101 = vmax.xlane.f32.xlu1 %v54_v12 }
  0x1a   :  { %99 = vmax.xlane.f32.xlu0 %v53_v13  ;;  %p544_p9 = pnand %p543_p8, %p537_p5 }
  0x1d   :  { %105 = vmax.xlane.f32.xlu1 %v56_v14 }
  0x1e   :  { %103 = vmax.xlane.f32.xlu0 %v55_v15 }
  0x9a   :  { %v63_v24 = vpop.xlane.xlu1 %62 }
  0x9b   :  { %v59_v26 = vpop.xlane.xlu0 %58  ;;  %v86_v29 = vrot.slane %v63_v24, %v74_v25 }
  0x9c   :  { %v75_v32 = vrot.slane %v59_v26, %v74_v25 }
  0x9e   :  { %v65_v28 = vpop.xlane.xlu1 %64 }
  0x9f   :  { %v90_v30 = vrot.slane %v65_v28, %v79_v27  ;;  %v61_v31 = vpop.xlane.xlu0 %60 }
  0xa0   :  { %v80_v33 = vrot.slane %v61_v31, %v79_v27 }
  0xa1   :  { %v91_v34 = vsel %vm81_vm2, %v90_v30, %v86_v29 }
  0xa2   :  { %v82_v36 = vsel %vm81_vm2, %v80_v33, %v75_v32  ;;  %v102_v37 = vpop.xlane.xlu1 %101 }
  0xa3   :  { %v93_v38 = vsel %vm92_vm3, %v91_v34, %v82_v36  ;;  %v100_v39 = vpop.xlane.xlu0 %99  ;;  %v118_v41 = vrot.slane %v102_v37, %v79_v27 }
  0xa4   :  { %v95_v40 = vadd.f32 %v93_v38, %v57_v35  ;;  %v114_v42 = vrot.slane %v100_v39, %v74_v25 }
  0xa6   :  { %97 = vst.msk [vmem:[#allocation2] sm:$0x3] %vm33_vm0, %v95_v40  ;;  %v106_v43 = vpop.xlane.xlu1 %105  ;;  %v119_v48 = vsel %vm81_vm2, %v118_v41, %v114_v42 }
  0xa7   :  { %v127_v44 = vrot.slane %v106_v43, %v79_v27  ;;  %v104_v45 = vpop.xlane.xlu0 %103 }
  0xa8   :  { %v123_v46 = vrot.slane %v104_v45, %v74_v25 }
  0xaa   :  { %v128_v49 = vsel %vm81_vm2, %v127_v44, %v123_v46 }
  0xab   :  { %v129_v50 = vsel %vm92_vm3, %v128_v49, %v119_v48 }
  0xac   :  { %v131_v51 = vmax.f32 %v98_v47, %v129_v50 }
  0xad   :  { %v136_v52 = vld [vmem:[#allocation2] sm:$0x3] }
  0xae   :  { %132 = vst.msk [vmem:[#allocation3] sm:$0x3] %vm33_vm0, %v131_v51  ;;  %v137_v53 = vmul.f32 0.00390625, %v136_v52 }
  0xb0   :  { %486 = vmatmul.mubr.msk.f32.vlgmr.msra.gmra.mxu0 %vm142_vm4, %v137_v53 }
  0xb1   :  { %497 = vmatprep.mubr.msk.f32.mxu0 %vm565_vm1, %v563_v16  ;;  %496 = vmatpush3.msk.msra.mxu0 %vm295_vm5, %v141_v55 }
  0xb5   :  { %v138_v54 = vld [vmem:[#allocation3] sm:$0x3] }
  0xb6   :  { %493 = vmatmul.mubr.msk.f32.vlgmr.msra.gmra.mxu1 %vm142_vm4, %v138_v54 }
  0xb7   :  { %502 = vmatprep.mubr.msk.f32.mxu1 %vm565_vm1, %v563_v16  ;;  %501 = vmatpush3.msk.msra.mxu1 %vm295_vm5, %v141_v55 }
 0x170   :  { %v212_v56 = vpop.f32.mrf.mxu0 }
 0x171   :  { %v216_v57 = vmax.f32 %v212_v56, 0.0 }
 0x172   :  { %v487_v58 = vpop.f32.mrf.mxu0 }
 0x173   :  { %503 = vmatmul.mubr.msk.f32.vlgmr.msra.gmra.mxu1 %vm291_vm6, %v216_v57 }
 0x176   :  { %v286_v59 = vpop.f32.mrf.mxu1 }
 0x177   :  { %v290_v60 = vmax.f32 %v286_v59, 0.0 }
 0x178   :  { %v494_v61 = vpop.f32.mrf.mxu1 }
 0x179   :  { %498 = vmatmul.mubr.msk.f32.vlgmr.msra.gmra.mxu0 %vm291_vm6, %v290_v60 }
 0x233   :  { %v438_v62 = vpop.f32.mrf.mxu1 }
 0x235   :  { %v504_v63 = vpop.f32.mrf.mxu1 }
 0x239   :  { %v365_v0 = vpop.f32.mrf.mxu0 }
 0x23a   :  { %v439_v1 = vadd.f32 %v438_v62, %v365_v0 }
 0x23b   :  { %v499_v2 = vpop.f32.mrf.mxu0 }
 0x23c   :  { %v470_v3 = vmul.f32 -1.442695, %v439_v1 }
 0x23e   :  { %512 = vpow2.f32 %v470_v3 }
 0x24b   :  { %v513_v4 = vpop.eup %512 }
 0x24c   :  { %v445_v5 = vadd.f32 1.0, %v513_v4 }
 0x24e   :  { %514 = vrcp.f32 %v445_v5 }
 0x25b   :  { %v515_v6 = vpop.eup %514 }
 0x25c   :  { %448 = vst.msk [vmem:[#allocation7] sm:$0x3] %vm33_vm0, %v515_v6 }
 0x25d   :  { %547 = shalt.err (!%p544_p9)
}
 0x25e   :  { %458 = dma.vmem_to_hbm [thread:$0]  %s456_s23, 32, %s631_s3, [#allocation6]  }
 0x25f   :  { %558 = dma.done.wait [#allocation6], 32  }
 0x260   :  { %559 = vsyncadd [#allocation6], 4294967264 }
 0x261   :  { %462 = vsyncpa [#allocation5], 1 }
 0x262   :  { %463 = vsyncpa [#allocation6], 1 }

</bundles_post_ra>
